<compile_context>
chip_gen: v6e
topology: v6e:2x2x1
jax: 0.10.0
libtpu: 0.0.40
codegen_flags: <defaults>
</compile_context>

<pallas_src>
import math

import jax
import jax.numpy as jnp
import numpy as np
from jax.experimental import pallas as pl
from jax.experimental.pallas import tpu as pltpu

# ----------------------------- model hyperparams -----------------------------
INPUT_DIM = 32
ENCODE_LAYERS = [64, 32]
Z_DIM = 16
NUM_BATCHES = 4
DECODE_LAYERS = [32, 64]
SHARED_CLASSES = 4
TOTAL_CLASSES = 6
TAU = 1.0

IN_W = INPUT_DIM + NUM_BATCHES              # packed [x | batch] input width (36)
HEAD_W = 4 * INPUT_DIM                      # fused mean|disp|pi|mask -> 128 lanes
K_ALL = SHARED_CLASSES + TOTAL_CLASSES      # fused prototypes -> 10 lanes

# ------------------------- packed output-slab layout --------------------------
MEAN_OFF = 0
DISP_OFF = INPUT_DIM
PI_OFF = 2 * INPUT_DIM
MASK_OFF = 3 * INPUT_DIM
Z_OFF = HEAD_W                              # 128
S_OFF = Z_OFF + Z_DIM                       # 144
T_OFF = S_OFF + SHARED_CLASSES              # 148
USED_W = T_OFF + TOTAL_CLASSES              # 154
OUT_W = 160                                 # 128 + 16 + 10 + 6 pad (full last dim)

# ------------------------- packed weight-slab layout --------------------------
SEG_ROWS = 72                               # 64 max weight rows + bias row, /8
SEG_LANES = 128                             # each segment owns one 128-lane block
BIAS_ROW = 64                               # bias (or ||c||^2) lives in this row


def _round_up(x, m):
    return ((x + m - 1) // m) * m


# ------------------------------ host-side packing -----------------------------
def pack_params(params):
    """Pack all weights+biases into ONE (n_seg, 72, 128) lane-0-aligned slab."""
    (ew1, eb1, ew2, eb2, mw, mb, dw1, db1, dw2, db2,
     meanw, meanb, dispw, dispb, piw, pib, mkw, mkb, cs, ct) = params

    # fused output heads: cat weights along output axis -> (64, 128)
    headw = jnp.concatenate([meanw, dispw, piw, mkw], axis=1)
    headb = jnp.concatenate([meanb, dispb, pib, mkb], axis=1)

    # fused prototypes: cat clusters -> (10,16), pre-transpose, precompute ||c||^2
    c = jnp.concatenate([cs, ct], axis=0)
    ct_t = c.T                                            # (Z_DIM, K_ALL)
    c2 = jnp.sum(c * c, axis=1, keepdims=True).T          # (1, K_ALL)

    # split decoder first layer so the kernel never concatenates [z, batch]
    dw1_z = dw1[:Z_DIM]                                   # (16, 32)
    dw1_b = dw1[Z_DIM:]                                   # (4, 32)

    segs = [
        ("headw", headw, headb),
        ("ew1", ew1, eb1),
        ("ew2", ew2, eb2),
        ("mw", mw, mb),
        ("dw1z", dw1_z, db1),
        ("dw1b", dw1_b, None),
        ("dw2", dw2, db2),
        ("ct_t", ct_t, c2),
    ]

    blob = np.zeros((len(segs), SEG_ROWS, SEG_LANES), np.float32)
    layout = {}
    for i, (name, w, b) in enumerate(segs):
        w = np.asarray(w, np.float32)
        r, col = w.shape
        blob[i, :r, :col] = w
        if b is not None:
            b = np.asarray(b, np.float32)
            blob[i, BIAS_ROW, : b.shape[1]] = b[0]
        layout[name] = (i, r, col)                        # static Python ints
    return jnp.asarray(blob), layout


# --------------------------------- kernel ------------------------------------
def _make_kernel(layout):
    def kernel(xb_ref, w_ref, out_ref):
        f32 = jnp.float32

        def W(name):
            i, r, c = layout[name]
            return w_ref[i, 0:r, 0:c]

        def B(name):
            i, _, c = layout[name]
            return w_ref[i, BIAS_ROW:BIAS_ROW + 1, 0:c]

        xb = xb_ref[...]
        x = xb[:, 0:INPUT_DIM]
        bvec = xb[:, INPUT_DIM:INPUT_DIM + NUM_BATCHES]

        # ---- encoder: Linear -> (GaussianNoise: identity) -> ReLU, twice ----
        # TODO(synk): training-mode Gaussian noise not added.
        h = jnp.maximum(jnp.dot(x, W("ew1"), preferred_element_type=f32) + B("ew1"), 0.0)
        h = jnp.maximum(jnp.dot(h, W("ew2"), preferred_element_type=f32) + B("ew2"), 0.0)

        # ---- latent ----
        z = jnp.dot(h, W("mw"), preferred_element_type=f32) + B("mw")

        # ---- decoder on [z | batch] without a lane concat ----
        d = jnp.maximum(
            jnp.dot(z, W("dw1z"), preferred_element_type=f32)
            + jnp.dot(bvec, W("dw1b"), preferred_element_type=f32)
            + B("dw1z"), 0.0)
        d = jnp.maximum(jnp.dot(d, W("dw2"), preferred_element_type=f32) + B("dw2"), 0.0)

        # ---- fused output heads: one (TM,64)@(64,128) matmul, shared exp ----
        head_lin = jnp.dot(d, W("headw"), preferred_element_type=f32) + B("headw")
        big = head_lin > 30.0
        e = jnp.exp(head_lin)                                           # one EUP pass
        mean_v = jnp.clip(e, 1e-5, 1e6)                                 # MeanAct
        disp_v = jnp.clip(jnp.where(big, head_lin, jnp.log1p(e)), 1e-4, 1e4)  # DispAct
        sig_v = jnp.where(big, 1.0, e / (1.0 + e))                      # pi / mask
        lane = jax.lax.broadcasted_iota(jnp.int32, head_lin.shape, 1)
        head = jnp.where(lane < INPUT_DIM, mean_v,
                         jnp.where(lane < 2 * INPUT_DIM, disp_v, sig_v))

        # ---- fused prototype classifiers (Student's-t similarity) ----
        # ||z - c||^2 = ||z||^2 - 2 z.c + ||c||^2   (clamped at 0 for fp safety)
        zc = jnp.dot(z, W("ct_t"), preferred_element_type=f32)          # (TM, K_ALL)
        z2 = jnp.sum(z * z, axis=1, keepdims=True)                      # (TM, 1)
        dist = jnp.maximum(z2 - 2.0 * zc + B("ct_t"), 0.0)
        base = 1.0 + dist / TAU
        expo = (TAU + 1.0) / 2.0
        if expo == 1.0:        # TAU=1 -> exponent is exactly 1 -> plain reciprocal
            sim = 1.0 / base
        else:
            sim = base ** (-expo)

        # ---- single lane-dense output slab: [mean|disp|pi|mask | z | s|t | 0] ----
        pad = jnp.zeros((head.shape[0], OUT_W - USED_W), f32)
        out_ref[...] = jnp.concatenate([head, z, sim, pad], axis=1)

    return kernel


# -------------------------------- wrapper -------------------------------------
def scopen1_forward(x, batch, wblob, layout, tm=None):
    n = x.shape[0]
    if tm is None:
        # biggest tile that fits every generation's default scoped-VMEM budget
        tm = min(2048, _round_up(max(n, 8), 8))
    tm = _round_up(tm, 8)
    n_pad = _round_up(max(n, tm), tm)

    xb = jnp.concatenate([x, batch], axis=1)               # one input (N, 36)
    if n_pad != n:
        xb = jnp.pad(xb, ((0, n_pad - n), (0, 0)))

    slab = pl.pallas_call(
        _make_kernel(layout),
        out_shape=jax.ShapeDtypeStruct((n_pad, OUT_W), jnp.float32),
        grid=(n_pad // tm,),
        in_specs=[
            pl.BlockSpec((tm, IN_W), lambda i: (i, 0)),
            # constant index_map -> blob fetched once, kept VMEM-resident
            pl.BlockSpec(wblob.shape, lambda i: (0, 0, 0)),
        ],
        out_specs=pl.BlockSpec((tm, OUT_W), lambda i: (i, 0)),
        compiler_params=pltpu.CompilerParams(dimension_semantics=("parallel",)),
    )(xb, wblob)

    slab = slab[:n]
    z = slab[:, Z_OFF:Z_OFF + Z_DIM]
    mean = slab[:, MEAN_OFF:MEAN_OFF + INPUT_DIM]
    disp = slab[:, DISP_OFF:DISP_OFF + INPUT_DIM]
    pi = slab[:, PI_OFF:PI_OFF + INPUT_DIM]
    mask = slab[:, MASK_OFF:MASK_OFF + INPUT_DIM]
    s = slab[:, S_OFF:S_OFF + SHARED_CLASSES]
    t = slab[:, T_OFF:T_OFF + TOTAL_CLASSES]
    return z, mean, disp, pi, mask, s, t


# ------------------------------ param helpers ---------------------------------
def linear_params(key, fan_in, fan_out):
    """PyTorch nn.Linear default init: U(-1/sqrt(fan_in), 1/sqrt(fan_in))."""
    kw, kb = jax.random.split(key)
    bound = 1.0 / math.sqrt(fan_in)
    w = jax.random.uniform(kw, (fan_in, fan_out), jnp.float32, -bound, bound)
    b = jax.random.uniform(kb, (1, fan_out), jnp.float32, -bound, bound)
    return w, b


def xavier_uniform(key, num_classes, dim):
    bound = math.sqrt(6.0 / (num_classes + dim))
    return jax.random.uniform(key, (num_classes, dim), jnp.float32, -bound, bound)


def init_params(key):
    keys = jax.random.split(key, 11)
    ew1, eb1 = linear_params(keys[0], INPUT_DIM, ENCODE_LAYERS[0])
    ew2, eb2 = linear_params(keys[1], ENCODE_LAYERS[0], ENCODE_LAYERS[1])
    mw, mb = linear_params(keys[2], ENCODE_LAYERS[1], Z_DIM)
    dw1, db1 = linear_params(keys[3], Z_DIM + NUM_BATCHES, DECODE_LAYERS[0])
    dw2, db2 = linear_params(keys[4], DECODE_LAYERS[0], DECODE_LAYERS[1])
    meanw, meanb = linear_params(keys[5], DECODE_LAYERS[1], INPUT_DIM)
    dispw, dispb = linear_params(keys[6], DECODE_LAYERS[1], INPUT_DIM)
    piw, pib = linear_params(keys[7], DECODE_LAYERS[1], INPUT_DIM)
    mkw, mkb = linear_params(keys[8], DECODE_LAYERS[1], INPUT_DIM)
    cs = xavier_uniform(keys[9], SHARED_CLASSES, Z_DIM)
    ct = xavier_uniform(keys[10], TOTAL_CLASSES, Z_DIM)
    return (ew1, eb1, ew2, eb2, mw, mb, dw1, db1, dw2, db2,
            meanw, meanb, dispw, dispb, piw, pib, mkw, mkb, cs, ct)


# --------------------------- pure-JAX reference --------------------------------
def scopen1_reference(x, batch, params):
    (ew1, eb1, ew2, eb2, mw, mb, dw1, db1, dw2, db2,
     meanw, meanb, dispw, dispb, piw, pib, mkw, mkb, cs, ct) = params
    h = jnp.maximum(x @ ew1 + eb1, 0.0)
    h = jnp.maximum(h @ ew2 + eb2, 0.0)
    z = h @ mw + mb
    d = jnp.maximum(jnp.concatenate([z, batch], axis=1) @ dw1 + db1, 0.0)
    d = jnp.maximum(d @ dw2 + db2, 0.0)
    mean = jnp.clip(jnp.exp(d @ meanw + meanb), 1e-5, 1e6)
    disp = jnp.clip(jax.nn.softplus(d @ dispw + dispb), 1e-4, 1e4)
    pi = jax.nn.sigmoid(d @ piw + pib)
    mask = jax.nn.sigmoid(d @ mkw + mkb)

    def proto(c):
        dist = jnp.sum(jnp.square(z[:, None, :] - c[None, :, :]), axis=2)
        return 1.0 / (1.0 + dist / TAU) ** ((TAU + 1.0) / 2.0)

    return z, mean, disp, pi, mask, proto(cs), proto(ct)


# ---------------------------------- main ---------------------------------------
if __name__ == "__main__":
    key = jax.random.PRNGKey(0)
    k_p, k1, k2, k3, k4 = jax.random.split(key, 5)

    params = init_params(k_p)
    wblob, layout = pack_params(params)

    def check(n, tm, kx, kb):
        x = jax.random.normal(kx, (n, INPUT_DIM), jnp.float32)
        batch_ids = jax.random.randint(kb, (n,), 0, NUM_BATCHES)
        batch = jax.nn.one_hot(batch_ids, NUM_BATCHES, dtype=jnp.float32)
        outs = scopen1_forward(x, batch, wblob, layout, tm=tm)
        outs = jax.block_until_ready(outs)
        refs = scopen1_reference(x, batch, params)
        for o, r in zip(outs, refs):
            assert o.shape == r.shape and o.dtype == r.dtype
            np.testing.assert_allclose(np.asarray(o), np.asarray(r),
                                       rtol=1e-4, atol=1e-5)

    # small single-tile case (grid of 1)
    check(8, None, k1, k2)
    # multi-step row grid with padding (n=200 -> padded to 256, 4 tiles of 64)
    check(200, 64, k3, k4)

    print("KERNEL_OK")
</pallas_src>

<mosaic_0001>
module attributes {stable_mosaic.version = 11 : i64} {
  func.func @kernel(%arg0: i32, %arg1: memref<8x36xf32, #tpu.memory_space<vmem>>, %arg2: memref<8x72x128xf32, #tpu.memory_space<vmem>>, %arg3: memref<8x160xf32, #tpu.memory_space<vmem>>) attributes {dimension_semantics = [#tpu.dimension_semantics<parallel>], iteration_bounds = array<i64: 1>, scalar_prefetch = 0 : i64, scratch_operands = 0 : i64, tpu.core_type = #tpu.core_type<tc>, window_params = [{transform_indices = @transform_0, window_bounds = array<i64: 8, 36>}, {pipeline_mode = #tpu.pipeline_mode<synchronous>, transform_indices = @transform_1, window_bounds = array<i64: 8, 72, 128>}, {transform_indices = @transform_2, window_bounds = array<i64: 8, 160>}]} {
    %c0 = arith.constant 0 : index
    %c0_0 = arith.constant 0 : index
    %0 = vector.load %arg1[%c0, %c0_0] : memref<8x36xf32, #tpu.memory_space<vmem>>, vector<8x36xf32>
    %1 = vector.extract_strided_slice %0 {offsets = [0, 0], sizes = [8, 32], strides = [1, 1]} : vector<8x36xf32> to vector<8x32xf32>
    %2 = vector.extract_strided_slice %0 {offsets = [0, 32], sizes = [8, 4], strides = [1, 1]} : vector<8x36xf32> to vector<8x4xf32>
    %c1 = arith.constant 1 : index
    %c0_1 = arith.constant 0 : index
    %c0_2 = arith.constant 0 : index
    %3 = vector.load %arg2[%c1, %c0_1, %c0_2] : memref<8x72x128xf32, #tpu.memory_space<vmem>>, vector<1x32x64xf32>
    %4 = vector.shape_cast %3 : vector<1x32x64xf32> to vector<32x64xf32>
    %cst = arith.constant dense<0.000000e+00> : vector<8x64xf32>
    %5 = tpu.matmul %1, %4, %cst {dimension_numbers = #tpu.dot_dimension_numbers<[1], [0], [0], [1], [0, 0, 1, 1], [], []>} : vector<8x32xf32>, vector<32x64xf32>, vector<8x64xf32> -> vector<8x64xf32>
    %c1_3 = arith.constant 1 : index
    %c64 = arith.constant 64 : index
    %c0_4 = arith.constant 0 : index
    %6 = vector.load %arg2[%c1_3, %c64, %c0_4] : memref<8x72x128xf32, #tpu.memory_space<vmem>>, vector<1x1x64xf32>
    %7 = vector.shape_cast %6 : vector<1x1x64xf32> to vector<1x64xf32>
    %8 = vector.broadcast %7 : vector<1x64xf32> to vector<8x64xf32>
    %9 = arith.addf %5, %8 : vector<8x64xf32>
    %cst_5 = arith.constant 0.000000e+00 : f32
    %10 = vector.broadcast %cst_5 : f32 to vector<8x64xf32>
    %11 = arith.maximumf %9, %10 : vector<8x64xf32>
    %c2 = arith.constant 2 : index
    %c0_6 = arith.constant 0 : index
    %c0_7 = arith.constant 0 : index
    %12 = vector.load %arg2[%c2, %c0_6, %c0_7] : memref<8x72x128xf32, #tpu.memory_space<vmem>>, vector<1x64x32xf32>
    %13 = vector.shape_cast %12 : vector<1x64x32xf32> to vector<64x32xf32>
    %cst_8 = arith.constant dense<0.000000e+00> : vector<8x32xf32>
    %14 = tpu.matmul %11, %13, %cst_8 {dimension_numbers = #tpu.dot_dimension_numbers<[1], [0], [0], [1], [0, 0, 1, 1], [], []>} : vector<8x64xf32>, vector<64x32xf32>, vector<8x32xf32> -> vector<8x32xf32>
    %c2_9 = arith.constant 2 : index
    %c64_10 = arith.constant 64 : index
    %c0_11 = arith.constant 0 : index
    %15 = vector.load %arg2[%c2_9, %c64_10, %c0_11] : memref<8x72x128xf32, #tpu.memory_space<vmem>>, vector<1x1x32xf32>
    %16 = vector.shape_cast %15 : vector<1x1x32xf32> to vector<1x32xf32>
    %17 = vector.broadcast %16 : vector<1x32xf32> to vector<8x32xf32>
    %18 = arith.addf %14, %17 : vector<8x32xf32>
    %cst_12 = arith.constant 0.000000e+00 : f32
    %19 = vector.broadcast %cst_12 : f32 to vector<8x32xf32>
    %20 = arith.maximumf %18, %19 : vector<8x32xf32>
    %c3 = arith.constant 3 : index
    %c0_13 = arith.constant 0 : index
    %c0_14 = arith.constant 0 : index
    %21 = vector.load %arg2[%c3, %c0_13, %c0_14] : memref<8x72x128xf32, #tpu.memory_space<vmem>>, vector<1x32x16xf32>
    %22 = vector.shape_cast %21 : vector<1x32x16xf32> to vector<32x16xf32>
    %cst_15 = arith.constant dense<0.000000e+00> : vector<8x16xf32>
    %23 = tpu.matmul %20, %22, %cst_15 {dimension_numbers = #tpu.dot_dimension_numbers<[1], [0], [0], [1], [0, 0, 1, 1], [], []>} : vector<8x32xf32>, vector<32x16xf32>, vector<8x16xf32> -> vector<8x16xf32>
    %c3_16 = arith.constant 3 : index
    %c64_17 = arith.constant 64 : index
    %c0_18 = arith.constant 0 : index
    %24 = vector.load %arg2[%c3_16, %c64_17, %c0_18] : memref<8x72x128xf32, #tpu.memory_space<vmem>>, vector<1x1x16xf32>
    %25 = vector.shape_cast %24 : vector<1x1x16xf32> to vector<1x16xf32>
    %26 = vector.broadcast %25 : vector<1x16xf32> to vector<8x16xf32>
    %27 = arith.addf %23, %26 : vector<8x16xf32>
    %c4 = arith.constant 4 : index
    %c0_19 = arith.constant 0 : index
    %c0_20 = arith.constant 0 : index
    %28 = vector.load %arg2[%c4, %c0_19, %c0_20] : memref<8x72x128xf32, #tpu.memory_space<vmem>>, vector<1x16x32xf32>
    %29 = vector.shape_cast %28 : vector<1x16x32xf32> to vector<16x32xf32>
    %cst_21 = arith.constant dense<0.000000e+00> : vector<8x32xf32>
    %30 = tpu.matmul %27, %29, %cst_21 {dimension_numbers = #tpu.dot_dimension_numbers<[1], [0], [0], [1], [0, 0, 1, 1], [], []>} : vector<8x16xf32>, vector<16x32xf32>, vector<8x32xf32> -> vector<8x32xf32>
    %c5 = arith.constant 5 : index
    %c0_22 = arith.constant 0 : index
    %c0_23 = arith.constant 0 : index
    %31 = vector.load %arg2[%c5, %c0_22, %c0_23] : memref<8x72x128xf32, #tpu.memory_space<vmem>>, vector<1x4x32xf32>
    %32 = vector.shape_cast %31 : vector<1x4x32xf32> to vector<4x32xf32>
    %cst_24 = arith.constant dense<0.000000e+00> : vector<8x32xf32>
    %33 = tpu.matmul %2, %32, %cst_24 {dimension_numbers = #tpu.dot_dimension_numbers<[1], [0], [0], [1], [0, 0, 1, 1], [], []>} : vector<8x4xf32>, vector<4x32xf32>, vector<8x32xf32> -> vector<8x32xf32>
    %34 = arith.addf %30, %33 : vector<8x32xf32>
    %c4_25 = arith.constant 4 : index
    %c64_26 = arith.constant 64 : index
    %c0_27 = arith.constant 0 : index
    %35 = vector.load %arg2[%c4_25, %c64_26, %c0_27] : memref<8x72x128xf32, #tpu.memory_space<vmem>>, vector<1x1x32xf32>
    %36 = vector.shape_cast %35 : vector<1x1x32xf32> to vector<1x32xf32>
    %37 = vector.broadcast %36 : vector<1x32xf32> to vector<8x32xf32>
    %38 = arith.addf %34, %37 : vector<8x32xf32>
    %cst_28 = arith.constant 0.000000e+00 : f32
    %39 = vector.broadcast %cst_28 : f32 to vector<8x32xf32>
    %40 = arith.maximumf %38, %39 : vector<8x32xf32>
    %c6 = arith.constant 6 : index
    %c0_29 = arith.constant 0 : index
    %c0_30 = arith.constant 0 : index
    %41 = vector.load %arg2[%c6, %c0_29, %c0_30] : memref<8x72x128xf32, #tpu.memory_space<vmem>>, vector<1x32x64xf32>
    %42 = vector.shape_cast %41 : vector<1x32x64xf32> to vector<32x64xf32>
    %cst_31 = arith.constant dense<0.000000e+00> : vector<8x64xf32>
    %43 = tpu.matmul %40, %42, %cst_31 {dimension_numbers = #tpu.dot_dimension_numbers<[1], [0], [0], [1], [0, 0, 1, 1], [], []>} : vector<8x32xf32>, vector<32x64xf32>, vector<8x64xf32> -> vector<8x64xf32>
    %c6_32 = arith.constant 6 : index
    %c64_33 = arith.constant 64 : index
    %c0_34 = arith.constant 0 : index
    %44 = vector.load %arg2[%c6_32, %c64_33, %c0_34] : memref<8x72x128xf32, #tpu.memory_space<vmem>>, vector<1x1x64xf32>
    %45 = vector.shape_cast %44 : vector<1x1x64xf32> to vector<1x64xf32>
    %46 = vector.broadcast %45 : vector<1x64xf32> to vector<8x64xf32>
    %47 = arith.addf %43, %46 : vector<8x64xf32>
    %cst_35 = arith.constant 0.000000e+00 : f32
    %48 = vector.broadcast %cst_35 : f32 to vector<8x64xf32>
    %49 = arith.maximumf %47, %48 : vector<8x64xf32>
    %c0_36 = arith.constant 0 : index
    %c0_37 = arith.constant 0 : index
    %c0_38 = arith.constant 0 : index
    %50 = vector.load %arg2[%c0_36, %c0_37, %c0_38] : memref<8x72x128xf32, #tpu.memory_space<vmem>>, vector<1x64x128xf32>
    %51 = vector.shape_cast %50 : vector<1x64x128xf32> to vector<64x128xf32>
    %cst_39 = arith.constant dense<0.000000e+00> : vector<8x128xf32>
    %52 = tpu.matmul %49, %51, %cst_39 {dimension_numbers = #tpu.dot_dimension_numbers<[1], [0], [0], [1], [0, 0, 1, 1], [], []>} : vector<8x64xf32>, vector<64x128xf32>, vector<8x128xf32> -> vector<8x128xf32>
    %c0_40 = arith.constant 0 : index
    %c64_41 = arith.constant 64 : index
    %c0_42 = arith.constant 0 : index
    %53 = vector.load %arg2[%c0_40, %c64_41, %c0_42] : memref<8x72x128xf32, #tpu.memory_space<vmem>>, vector<1x1x128xf32>
    %54 = vector.shape_cast %53 : vector<1x1x128xf32> to vector<1x128xf32>
    %55 = vector.broadcast %54 : vector<1x128xf32> to vector<8x128xf32>
    %56 = arith.addf %52, %55 : vector<8x128xf32>
    %cst_43 = arith.constant 3.000000e+01 : f32
    %57 = vector.broadcast %cst_43 : f32 to vector<8x128xf32>
    %58 = arith.cmpf ogt, %56, %57 : vector<8x128xf32>
    %59 = math.exp %56 : vector<8x128xf32>
    %cst_44 = arith.constant 9.99999974E-6 : f32
    %cst_45 = arith.constant 1.000000e+06 : f32
    %60 = vector.broadcast %cst_44 : f32 to vector<8x128xf32>
    %61 = arith.maximumf %60, %59 : vector<8x128xf32>
    %62 = vector.broadcast %cst_45 : f32 to vector<8x128xf32>
    %63 = arith.minimumf %62, %61 : vector<8x128xf32>
    %64 = math.log1p %59 : vector<8x128xf32>
    %65 = arith.select %58, %56, %64 : vector<8x128xi1>, vector<8x128xf32>
    %cst_46 = arith.constant 9.99999974E-5 : f32
    %cst_47 = arith.constant 1.000000e+04 : f32
    %66 = vector.broadcast %cst_46 : f32 to vector<8x128xf32>
    %67 = arith.maximumf %66, %65 : vector<8x128xf32>
    %68 = vector.broadcast %cst_47 : f32 to vector<8x128xf32>
    %69 = arith.minimumf %68, %67 : vector<8x128xf32>
    %cst_48 = arith.constant 1.000000e+00 : f32
    %70 = vector.broadcast %cst_48 : f32 to vector<8x128xf32>
    %71 = arith.addf %70, %59 : vector<8x128xf32>
    %72 = arith.divf %59, %71 : vector<8x128xf32>
    %cst_49 = arith.constant 1.000000e+00 : f32
    %73 = vector.broadcast %cst_49 : f32 to vector<8x128xf32>
    %74 = arith.select %58, %73, %72 : vector<8x128xi1>, vector<8x128xf32>
    %75 = tpu.iota {dimensions = array<i32: 1>} : vector<8x128xi32>
    %c32_i32 = arith.constant 32 : i32
    %76 = vector.broadcast %c32_i32 : i32 to vector<8x128xi32>
    %77 = arith.cmpi slt, %75, %76 : vector<8x128xi32>
    %c64_i32 = arith.constant 64 : i32
    %78 = vector.broadcast %c64_i32 : i32 to vector<8x128xi32>
    %79 = arith.cmpi slt, %75, %78 : vector<8x128xi32>
    %80 = arith.select %79, %69, %74 : vector<8x128xi1>, vector<8x128xf32>
    %81 = arith.select %77, %63, %80 : vector<8x128xi1>, vector<8x128xf32>
    %c7 = arith.constant 7 : index
    %c0_50 = arith.constant 0 : index
    %c0_51 = arith.constant 0 : index
    %82 = vector.load %arg2[%c7, %c0_50, %c0_51] : memref<8x72x128xf32, #tpu.memory_space<vmem>>, vector<1x16x10xf32>
    %83 = vector.shape_cast %82 : vector<1x16x10xf32> to vector<16x10xf32>
    %cst_52 = arith.constant dense<0.000000e+00> : vector<8x10xf32>
    %84 = tpu.matmul %27, %83, %cst_52 {dimension_numbers = #tpu.dot_dimension_numbers<[1], [0], [0], [1], [0, 0, 1, 1], [], []>} : vector<8x16xf32>, vector<16x10xf32>, vector<8x10xf32> -> vector<8x10xf32>
    %85 = arith.mulf %27, %27 : vector<8x16xf32>
    %cst_53 = arith.constant dense<0.000000e+00> : vector<8xf32>
    %86 = vector.multi_reduction <add>, %85, %cst_53 [1] : vector<8x16xf32> to vector<8xf32>
    %87 = vector.shape_cast %86 : vector<8xf32> to vector<8x1xf32>
    %cst_54 = arith.constant 2.000000e+00 : f32
    %88 = vector.broadcast %cst_54 : f32 to vector<8x10xf32>
    %89 = arith.mulf %88, %84 : vector<8x10xf32>
    %90 = vector.broadcast %87 : vector<8x1xf32> to vector<8x10xf32>
    %91 = arith.subf %90, %89 : vector<8x10xf32>
    %c7_55 = arith.constant 7 : index
    %c64_56 = arith.constant 64 : index
    %c0_57 = arith.constant 0 : index
    %92 = vector.load %arg2[%c7_55, %c64_56, %c0_57] : memref<8x72x128xf32, #tpu.memory_space<vmem>>, vector<1x1x10xf32>
    %93 = vector.shape_cast %92 : vector<1x1x10xf32> to vector<1x10xf32>
    %94 = vector.broadcast %93 : vector<1x10xf32> to vector<8x10xf32>
    %95 = arith.addf %91, %94 : vector<8x10xf32>
    %cst_58 = arith.constant 0.000000e+00 : f32
    %96 = vector.broadcast %cst_58 : f32 to vector<8x10xf32>
    %97 = arith.maximumf %95, %96 : vector<8x10xf32>
    %cst_59 = arith.constant 1.000000e+00 : f32
    %98 = vector.broadcast %cst_59 : f32 to vector<8x10xf32>
    %99 = arith.divf %97, %98 : vector<8x10xf32>
    %cst_60 = arith.constant 1.000000e+00 : f32
    %100 = vector.broadcast %cst_60 : f32 to vector<8x10xf32>
    %101 = arith.addf %100, %99 : vector<8x10xf32>
    %cst_61 = arith.constant 1.000000e+00 : f32
    %102 = vector.broadcast %cst_61 : f32 to vector<8x10xf32>
    %103 = arith.divf %102, %101 : vector<8x10xf32>
    %cst_62 = arith.constant 0.000000e+00 : f32
    %104 = vector.broadcast %cst_62 : f32 to vector<8x6xf32>
    %105 = tpu.concatenate %81, %27, %103, %104 in 1 : vector<8x128xf32>, vector<8x16xf32>, vector<8x10xf32>, vector<8x6xf32> -> vector<8x160xf32>
    %c0_63 = arith.constant 0 : index
    %c0_64 = arith.constant 0 : index
    %106 = vector.load %arg3[%c0_63, %c0_64] : memref<8x160xf32, #tpu.memory_space<vmem>>, vector<8x160xf32>
    tpu.vector_store %arg3[%c0_63, %c0_64], %105 {strides = array<i32>} : memref<8x160xf32, #tpu.memory_space<vmem>>, vector<8x160xf32>,
    return
  }
  func.func @transform_0(%arg0: i32) -> (i32, i32) {
    %c0_i32 = arith.constant 0 : i32
    %c0_i32_0 = arith.constant 0 : i32
    return %arg0, %c0_i32 : i32, i32
  }
  func.func @transform_1(%arg0: i32) -> (i32, i32, i32) {
    %c0_i32 = arith.constant 0 : i32
    %c0_i32_0 = arith.constant 0 : i32
    %c0_i32_1 = arith.constant 0 : i32
    %c0_i32_2 = arith.constant 0 : i32
    return %c0_i32, %c0_i32_0, %c0_i32_1 : i32, i32, i32
  }
  func.func @transform_2(%arg0: i32) -> (i32, i32) {
    %c0_i32 = arith.constant 0 : i32
    %c0_i32_0 = arith.constant 0 : i32
    return %arg0, %c0_i32 : i32, i32
  }
}

</mosaic_0001>

<bundles_post_ra>
// kernel: tpu_custom_call.1
= control target key start
LH: loop header
LB: loop body
LE: loop exit
PB: predicated region body
PF: predicated region fallthrough
CT: control target
= control target key end

     0   :  { %7 = vsyncpa [#allocation3], 0  ;;  %s1101_s0 = inlined_call_operand.hbm [shape: f32[8,36], index: 0, kind: input, shape index: {}]   ;;  %s1102_s1 = inlined_call_operand.hbm [shape: f32[8,72,128], index: 1, kind: input, shape index: {}]   ;;  %s1103_s2 = inlined_call_operand.hbm [shape: f32[8,160], index: 2, kind: output, shape index: {}]  }
   0x1   :  { %8 = vsyncpa [#allocation6], 0 }
   0x2   :  { %9 = vsyncpa [#allocation4], 0  ;;  %s1002_s9 = smov [#allocation2]   ;;  %s1003_s11 = smov [#allocation5]  }
   0x3   :  { %s16_s10 = sshll.u32 %s1002_s9, 4  ;;  %s25_s12 = sshll.u32 %s1003_s11, 4  ;;  %s17_s10 = int_to_ptr.vmem [resolvable:$true] %s16_s10  ;;  %s26_s12 = int_to_ptr.vmem [resolvable:$true] %s25_s12 }
   0x4   :  { %s944_s13 = scalar_lea.vmem %s17_s10, 128  ;;  %p949_p1 = scmp.lt.s32.totalorder %s17_s10, %s17_s10 }
   0x5   :  { %p945_p0 = scmp.ne.s32.totalorder %s17_s10, %s944_s13  ;;  %p950_p2 = scmp.lt.s32.totalorder %s944_s13, %s944_s13 }
   0x7   :  { %p951_p3 = por %p950_p2, %p949_p1 }
   0x9   :  { %p952_p4 = pnand %p951_p3, %p945_p0 }
   0xb   :  { %955 = shalt.err (!%p952_p4)
}
   0xc   :  { %19 = dma.hbm_to_vmem [thread:$0]  %s1101_s0, 128, %s17_s10, [#allocation3]  }
   0xd   :  { %s964_s16 = scalar_lea.vmem %s26_s12, 9216  ;;  %p969_p6 = scmp.lt.s32.totalorder %s26_s12, %s26_s12 }
   0xe   :  { %p965_p5 = scmp.ne.s32.totalorder %s26_s12, %s964_s16  ;;  %p970_p7 = scmp.lt.s32.totalorder %s964_s16, %s964_s16 }
  0x10   :  { %p971_p8 = por %p970_p7, %p969_p6 }
  0x12   :  { %p972_p9 = pnand %p971_p8, %p965_p5 }
  0x14   :  { %975 = shalt.err (!%p972_p9)
}
  0x15   :  { %s1004_s17 = smov 128   ;;  %s1005_s18 = smov 8  }
  0x16   :  { %31 = dma.hbm_to_vmem [thread:$0]  %s1102_s1, 9216, %s26_s12, [#allocation6], %s1004_s17, %s1004_s17, %s1005_s18  }
  0x17   :  { %996 = dma.done.wait [#allocation3], 128  }
  0x18   :  { %997 = vsyncadd [#allocation3], 4294967168 }
  0x19   :  { %998 = dma.done.wait [#allocation6], 9216  }
  0x1a   :  { %999 = vsyncadd [#allocation6], 4294958080  ;;  %v1006_v0 = vmov 0.0   ;;  %vm1007_vm0 = vmmov 0   ;;  %v43_v1 = vld [vmem:[#allocation5 + $0x60] sm:$0xff]  ;;  %v42_v2 = vld [vmem:[#allocation5 + $0x58] sm:$0xff] }
  0x1b   :  { %829 = vmatprep.subr.mxu0 %v1006_v0  ;;  %837 = vmatprep.mubr.msk.f32.mxu0 %vm1007_vm0, %v1006_v0  ;;  %v132_v3 = vld [vmem:[#allocation5 + $0xc8] sm:$0xff]  ;;  %v41_v4 = vld [vmem:[#allocation5 + $0x50] sm:$0xff]  ;;  %v131_v5 = vld [vmem:[#allocation5 + $0xc0] sm:$0xff]  ;;  %vm49_vm1 = vcmask 261120   ;;  %vm138_vm2 = vcmask 523264   ;;  %s1008_s0 = smov 96  }
  0x1c   :  { %840 = vmatprep.subr.mxu1 %v1006_v0  ;;  %856 = vmatprep.mubr.msk.f32.mxu1 %vm1007_vm0, %v1006_v0  ;;  %v130_v6 = vld [vmem:[#allocation5 + $0xb8] sm:$0xff]  ;;  %v40_v7 = vld [vmem:[#allocation5 + $0x48] sm:$0xff]  ;;  %v129_v9 = vld [vmem:[#allocation5 + $0xb0] sm:$0xff]  ;;  %vm306_vm3 = vcmask 1043456   ;;  %vm303_vm4 = vcmask 31744   ;;  %vm380_vm5 = vcmask 130048  }
  0x1d   :  { %830 = vmatpush3.msra.mxu0 %v43_v1  ;;  %841 = vmatpush3.msra.mxu1 %v132_v3  ;;  %v38_v8 = vld [vmem:[#allocation2] sm:$0xff]  ;;  %v128_v10 = vld [vmem:[#allocation5 + $0xa8] sm:$0xff]  ;;  %v127_v11 = vld [vmem:[#allocation5 + $0xa0] sm:$0xff]  ;;  %s1009_s1 = smov 16   ;;  %vm752_vm6 = vcmask 211968   ;;  %s1010_s21 = smov [#allocation7]  }
  0x1e   :  { %831 = vmatprep.subr.mxu0 %v1006_v0  ;;  %842 = vmatprep.subr.mxu1 %v1006_v0  ;;  %v126_v12 = vld [vmem:[#allocation5 + $0x98] sm:$0xff]  ;;  %v125_v13 = vld [vmem:[#allocation5 + $0x90] sm:$0xff]  ;;  %v772_v15 = vld [vmem:[#allocation5 + $0x88] ss:$0 sm:$0xff]  ;;  %s762_s22 = sshll.u32 %s1010_s21, 4  ;;  %s763_s22 = int_to_ptr.vmem [resolvable:$true] %s762_s22 }
  0x1f   :  { %832 = vmatpush3.msra.mxu0 %v42_v2  ;;  %843 = vmatpush3.msra.mxu1 %v131_v5  ;;  %v217_v14 = vld [vmem:[#allocation5 + $0xf0] sm:$0xff]  ;;  %v216_v20 = vld [vmem:[#allocation5 + $0xe8] sm:$0xff]  ;;  %v215_v21 = vld [vmem:[#allocation5 + $0xe0] sm:$0xff]  ;;  %s976_s23 = scalar_lea.vmem %s763_s22, 256  ;;  %p981_p11 = scmp.lt.s32.totalorder %s763_s22, %s763_s22 }
  0x20   :  { %833 = vmatprep.subr.mxu0 %v1006_v0  ;;  %844 = vmatprep.subr.mxu1 %v1006_v0  ;;  %v214_v22 = vld [vmem:[#allocation5 + $0xd8] sm:$0xff]  ;;  %v298_v23 = vld [vmem:[#allocation5 + $0x128] sm:$0xff]  ;;  %v774_v24 = vld [vmem:[#allocation5 + $0xd0] ss:$0 sm:$0xff]  ;;  %p977_p10 = scmp.ne.s32.totalorder %s763_s22, %s976_s23  ;;  %p982_p12 = scmp.lt.s32.totalorder %s976_s23, %s976_s23 }
  0x21   :  { %834 = vmatpush3.msra.mxu0 %v41_v4  ;;  %845 = vmatpush3.msra.mxu1 %v130_v6  ;;  %v300_v29 = vld [vmem:[#allocation5 + $0x168] sm:$0xf]  ;;  %v297_v31 = vld [vmem:[#allocation5 + $0x120] sm:$0xff]  ;;  %v776_v32 = vld [vmem:[#allocation5 + $0x118] ss:$0 sm:$0xff] }
  0x22   :  { %835 = vmatprep.subr.mxu0 %v1006_v0  ;;  %846 = vmatprep.subr.mxu1 %v1006_v0  ;;  %v465_v39 = vld [vmem:[#allocation5 + $0x1c8] sm:$0xff]  ;;  %v464_v41 = vld [vmem:[#allocation5 + $0x1c0] sm:$0xff]  ;;  %v463_v42 = vld [vmem:[#allocation5 + $0x1b8] sm:$0xff]  ;;  %p983_p13 = por %p982_p12, %p981_p11 }
  0x23   :  { %836 = vmatpush3.msra.mxu0 %v40_v7  ;;  %847 = vmatpush3.msra.mxu1 %v129_v9  ;;  %v462_v43 = vld [vmem:[#allocation5 + $0x1b0] sm:$0xff]  ;;  %v552_v44 = vld [vmem:[#allocation5 + $0x38] sm:$0xff]  ;;  %v550_v46 = vld [vmem:[#allocation5 + $0x28] sm:$0xff] }
  0x24   :  { %838 = vmatmul.mubr.msk.f32.vlgmr.msra.gmra.mxu0 %vm49_vm1, %v38_v8  ;;  %848 = vmatprep.subr.mxu1 %v1006_v0  ;;  %v551_v45 = vld [vmem:[#allocation5 + $0x30] sm:$0xff]  ;;  %v549_v47 = vld [vmem:[#allocation5 + $0x20] sm:$0xff]  ;;  %v548_v48 = vld [vmem:[#allocation5 + $0x18] sm:$0xff]  ;;  %p984_p0 = pnand %p983_p13, %p977_p10 }
  0x25   :  { %859 = vmatprep.subr.mxu0 %v1006_v0  ;;  %849 = vmatpush3.msra.mxu1 %v128_v10  ;;  %v781_v50 = vld [vmem:[#allocation5 + $0x160] ss:$0 sm:$0xff]  ;;  %v659_v56 = vld [vmem:[#allocation5 + $0x1f8] sm:$0xff]  ;;  %v547_v57 = vld [vmem:[#allocation5 + $0x10] sm:$0xff] }
  0x26   :  { %867 = vmatprep.mubr.msk.f32.mxu0 %vm1007_vm0, %v1006_v0  ;;  %850 = vmatprep.subr.mxu1 %v1006_v0  ;;  %v660_v55 = vld [vmem:[#allocation5 + $0x200] sm:$0xff]  ;;  %v546_v58 = vld [vmem:[#allocation5 + $0x8] sm:$0xff]  ;;  %v782_v60 = vld [vmem:[#allocation5 + $0x1f0] ss:$0 sm:$0xff] }
  0x27   :  { %851 = vmatpush3.msra.mxu1 %v127_v11  ;;  %860 = vmatpush3.msra.mxu0 %v217_v14  ;;  %v545_v59 = vld [vmem:[#allocation5] sm:$0xff]  ;;  %v787_v5 = vld [vmem:[#allocation5 + $0x238] ss:$0 sm:$0xff] }
  0x28   :  { %852 = vmatprep.subr.mxu1 %v1006_v0  ;;  %861 = vmatprep.subr.mxu0 %v1006_v0  ;;  %v784_v14 = vld [vmem:[#allocation5 + $0x40] ss:$0 sm:$0xff] }
  0x29   :  { %853 = vmatpush3.msra.mxu1 %v126_v12  ;;  %862 = vmatpush3.msra.mxu0 %v216_v20 }
  0x2a   :  { %854 = vmatprep.subr.mxu1 %v1006_v0  ;;  %863 = vmatprep.subr.mxu0 %v1006_v0 }
  0x2b   :  { %855 = vmatpush3.msra.mxu1 %v125_v13  ;;  %864 = vmatpush3.msra.mxu0 %v215_v21 }
  0x2c   :  { %875 = vmatprep.subr.mxu1 %v1006_v0  ;;  %865 = vmatprep.subr.mxu0 %v1006_v0 }
  0x2d   :  { %866 = vmatpush3.msra.mxu0 %v214_v22  ;;  %301 = vrot.lane.b32.xlu0 %v38_v8, %s1008_s0 }
  0x2e   :  { %870 = vmatprep.subr.mxu0 %v1006_v0 }
  0x9f   :  { %v302_v30 = vpop.permute.xlu0 %301 }
  0xe4   :  { %v119_v16 = vpop.f32.mrf.mxu0 }
  0xe5   :  { %v120_v17 = vadd.f32 %v772_v15, %v119_v16 }
  0xe6   :  { %v839_v18 = vpop.f32.mrf.mxu0 }
  0xe7   :  { %v123_v19 = vmax.f32 %v120_v17, 0.0 }
  0xe9   :  { %857 = vmatmul.mubr.msk.f32.vlgmr.msra.gmra.mxu1 %vm138_vm2, %v123_v19 }
  0xea   :  { %879 = vmatprep.mubr.msk.f32.mxu1 %vm1007_vm0, %v1006_v0  ;;  %876 = vmatpush3.msra.mxu1 %v298_v23 }
  0xeb   :  { %877 = vmatprep.subr.mxu1 %v1006_v0 }
  0xec   :  { %878 = vmatpush3.msra.mxu1 %v297_v31 }
  0xed   :  { %893 = vmatprep.subr.mxu1 %v1006_v0 }
 0x1a9   :  { %v208_v25 = vpop.f32.mrf.mxu1 }
 0x1aa   :  { %v209_v26 = vadd.f32 %v774_v24, %v208_v25  ;;  %v652_v24 = vlaneseq }
 0x1ab   :  { %v858_v27 = vpop.f32.mrf.mxu1 }
 0x1ac   :  { %v212_v28 = vmax.f32 %v209_v26, 0.0 }
 0x1ae   :  { %868 = vmatmul.mubr.msk.f32.vlgmr.msra.gmra.mxu0 %vm49_vm1, %v212_v28 }
 0x1af   :  { %871 = vmatpush3.msk.msra.mxu0 %vm306_vm3, %v300_v29  ;;  %872 = vmatprep.mubr.msk.f32.mxu0 %vm1007_vm0, %v1006_v0  ;;  %v653_v29 = vand.u32 127, %v652_v24 }
 0x1b0   :  { %882 = vmatprep.subr.mxu0 %v1006_v0 }
 0x1b1   :  { %vm655_vm9 = vcmp.lt.s32.totalorder %v653_v29, 64  ;;  %vm654_vm10 = vcmp.lt.s32.totalorder %v653_v29, 32 }
 0x1b2   :  { %873 = vmatmul.mubr.msk.f32.vlgmr.msra.gmra.mxu0 %vm303_vm4, %v302_v30 }
 0x1b3   :  { %890 = vmatprep.mubr.msk.f32.mxu0 %vm1007_vm0, %v1006_v0  ;;  %883 = vmatpush3.msra.mxu0 %v465_v39 }
 0x1b4   :  { %884 = vmatprep.subr.mxu0 %v1006_v0 }
 0x1b5   :  { %885 = vmatpush3.msra.mxu0 %v464_v41 }
 0x1b6   :  { %886 = vmatprep.subr.mxu0 %v1006_v0 }
 0x1b7   :  { %887 = vmatpush3.msra.mxu0 %v463_v42 }
 0x1b8   :  { %888 = vmatprep.subr.mxu0 %v1006_v0 }
 0x1b9   :  { %889 = vmatpush3.msra.mxu0 %v462_v43 }
 0x1ba   :  { %912 = vmatprep.subr.mxu0 %v1006_v0 }
 0x26e   :  { %v292_v33 = vpop.f32.mrf.mxu0 }
 0x26f   :  { %v1068_v34 = vadd.f32 %v776_v32, %v292_v33 }
 0x270   :  { %v869_v35 = vpop.f32.mrf.mxu0 }
 0x271   :  { %880 = vmatmul.mubr.msk.f32.vlgmr.msra.gmra.mxu1 %vm380_vm5, %v1068_v34  ;;  %v731_v36 = vmul.f32 %v1068_v34, %v1068_v34 }
 0x272   :  { %909 = vmatprep.mubr.msk.f32.mxu1 %vm1007_vm0, %v1006_v0  ;;  %v376_v38 = vpop.f32.mrf.mxu0  ;;  %894 = vmatpush3.msra.mxu1 %v552_v44 }
 0x273   :  { %v732_v37 = vsel %vm380_vm5, %v731_v36, 0.0  ;;  %895 = vmatprep.subr.mxu1 %v1006_v0 }
 0x274   :  { %733 = vadd.xlane.f32.xlu0 %v732_v37  ;;  %v874_v40 = vpop.f32.mrf.mxu0  ;;  %896 = vmatpush3.msra.mxu1 %v551_v45 }
 0x275   :  { %897 = vmatprep.subr.mxu1 %v1006_v0 }
 0x276   :  { %898 = vmatpush3.msra.mxu1 %v550_v46 }
 0x277   :  { %899 = vmatprep.subr.mxu1 %v1006_v0 }
 0x278   :  { %900 = vmatpush3.msra.mxu1 %v549_v47 }
 0x279   :  { %901 = vmatprep.subr.mxu1 %v1006_v0 }
 0x27a   :  { %902 = vmatpush3.msra.mxu1 %v548_v48 }
 0x27b   :  { %903 = vmatprep.subr.mxu1 %v1006_v0 }
 0x27c   :  { %904 = vmatpush3.msra.mxu1 %v547_v57 }
 0x27d   :  { %905 = vmatprep.subr.mxu1 %v1006_v0 }
 0x27e   :  { %906 = vmatpush3.msra.mxu1 %v546_v58 }
 0x27f   :  { %907 = vmatprep.subr.mxu1 %v1006_v0 }
 0x280   :  { %908 = vmatpush3.msra.mxu1 %v545_v59 }
 0x2fd   :  { %v734_v4 = vpop.xlane.xlu0 %733 }
 0x331   :  { %v450_v49 = vpop.f32.mrf.mxu1 }
 0x332   :  { %v451_v51 = vadd.f32 %v450_v49, %v376_v38 }
 0x333   :  { %v881_v52 = vpop.f32.mrf.mxu1 }
 0x334   :  { %v459_v53 = vadd.f32 %v781_v50, %v451_v51 }
 0x336   :  { %v460_v54 = vmax.f32 %v459_v53, 0.0 }
 0x338   :  { %891 = vmatmul.mubr.msk.f32.vlgmr.msra.gmra.mxu0 %vm49_vm1, %v460_v54 }
 0x339   :  { %913 = vmatpush3.msra.mxu0 %v660_v55  ;;  %916 = vmatprep.mubr.msk.f32.mxu0 %vm1007_vm0, %v1006_v0 }
 0x33a   :  { %914 = vmatprep.subr.mxu0 %v1006_v0 }
 0x33b   :  { %915 = vmatpush3.msra.mxu0 %v659_v56 }
 0x33c   :  { %917 = vmatmul.mubr.msk.f32.vlgmr.msra.gmra.mxu0 %vm380_vm5, %v1068_v34 }
 0x3f8   :  { %v540_v61 = vpop.f32.mrf.mxu0 }
 0x3f9   :  { %v541_v62 = vadd.f32 %v782_v60, %v540_v61 }
 0x3fa   :  { %v892_v63 = vpop.f32.mrf.mxu0 }
 0x3fb   :  { %v544_v1 = vmax.f32 %v541_v62, 0.0 }
 0x3fc   :  { %v727_v2 = vpop.f32.mrf.mxu0 }
 0x3fd   :  { %v735_v3 = vmul.f32 2.0, %v727_v2  ;;  %910 = vmatmul.mubr.msk.f32.vlgmr.msra.gmra.mxu1 %vm138_vm2, %v544_v1 }
 0x3fe   :  { %v918_v6 = vpop.f32.mrf.mxu0 }
 0x3ff   :  { %v736_v7 = vsub.f32 %v734_v4, %v735_v3 }
 0x401   :  { %v742_v8 = vadd.f32 %v787_v5, %v736_v7 }
 0x403   :  { %v743_v9 = vmax.f32 %v742_v8, 0.0 }
 0x405   :  { %v744_v10 = vadd.f32 1.0, %v743_v9 }
 0x407   :  { %928 = vrcp.f32 %v744_v10 }
 0x414   :  { %v929_v0 = vpop.eup %928 }
 0x415   :  { %748 = vrot.lane.b32.xlu1 %v929_v0, %s1009_s1 }
 0x487   :  { %v749_v11 = vpop.permute.xlu1 %748 }
 0x488   :  { %v751_v12 = vsel %vm380_vm5, %v1068_v34, %v749_v11 }
 0x489   :  { %v753_v13 = vsel %vm752_vm6, %v751_v12, 0.0 }
 0x48a   :  { %755 = vst.msk [vmem:[#allocation7 + $0x8] sm:$0xff] %vm49_vm1, %v753_v13 }
 0x4bd   :  { %v627_v15 = vpop.f32.mrf.mxu1 }
 0x4be   :  { %v628_v16 = vadd.f32 %v784_v14, %v627_v15 }
 0x4bf   :  { %v911_v17 = vpop.f32.mrf.mxu1 }
 0x4c0   :  { %v632_v18 = vmul.f32 1.442695, %v628_v16  ;;  %vm631_vm8 = vcmp.gt.f32.partialorder %v628_v16, 30.0 }
 0x4c2   :  { %930 = vpow2.f32 %v632_v18 }
 0x4cf   :  { %v931_v19 = vpop.eup %930 }
 0x4d0   :  { %v636_v20 = vadd.f32 1.0, %v931_v19  ;;  %v639_v21 = vmul.f32 -0.5, %v931_v19  ;;  %v642_v23 = vand.u32 2147483647, %v931_v19  ;;  %v634_v33 = vmax.f32 %v931_v19, 1e-05 }
 0x4d2   :  { %932 = vlog2.f32 %v636_v20  ;;  %v640_v22 = vadd.f32 1.0, %v639_v21  ;;  %vm643_vm7 = vcmp.lt.f32.partialorder %v642_v23, 0.0004427343  ;;  %v635_v37 = vmin.f32 %v634_v33, 1000000.0 }
 0x4d3   :  { %934 = vrcp.f32 %v636_v20 }
 0x4d4   :  { %v641_v28 = vmul.f32 %v931_v19, %v640_v22 }
 0x4df   :  { %v933_v25 = vpop.eup %932 }
 0x4e0   :  { %v935_v26 = vpop.eup %934  ;;  %v638_v27 = vmul.f32 0.6931472, %v933_v25 }
 0x4e1   :  { %v650_v32 = vmul.f32 %v935_v26, %v931_v19 }
 0x4e2   :  { %v644_v30 = vsel %vm643_vm7, %v641_v28, %v638_v27 }
 0x4e3   :  { %v645_v31 = vsel %vm631_vm8, %v628_v16, %v644_v30  ;;  %v651_v36 = vsel %vm631_vm8, 1.0, %v650_v32 }
 0x4e4   :  { %v646_v34 = vmax.f32 %v645_v31, 0.0001 }
 0x4e6   :  { %v647_v35 = vmin.f32 %v646_v34, 10000.0 }
 0x4e8   :  { %v656_v38 = vsel %vm655_vm9, %v647_v35, %v651_v36 }
 0x4e9   :  { %v657_v39 = vsel %vm654_vm10, %v635_v37, %v656_v38 }
 0x4ea   :  { %754 = vst [vmem:[#allocation7] sm:$0xff] %v657_v39 }
 0x4eb   :  { %987 = shalt.err (!%p984_p0)
}
 0x4ec   :  { %765 = dma.vmem_to_hbm [thread:$0]  %s763_s22, 256, %s1103_s2, [#allocation4]  }
 0x4ed   :  { %1000 = dma.done.wait [#allocation4], 256  }
 0x4ee   :  { %1001 = vsyncadd [#allocation4], 4294967040 }
 0x4ef   :  { %769 = vsyncpa [#allocation3], 1 }
 0x4f0   :  { %770 = vsyncpa [#allocation6], 1 }
 0x4f1   :  { %771 = vsyncpa [#allocation4], 1 }

</bundles_post_ra>
